<compile_context>
chip_gen: v7x
topology: tpu7x:2x2x1
jax: 0.10.0
libtpu: 0.0.40
codegen_flags: <defaults>
</compile_context>

<pallas_src>
import jax
import jax.numpy as jnp
from jax import lax
from jax.experimental import pallas as pl
from jax.experimental.pallas import tpu as pltpu


def _round_up(n, m):
    return ((n + m - 1) // m) * m


def _mlp_kernel(x_ref,
                w1_ref, b1_ref,
                w2_ref, b2_ref,
                w3_ref, b3_ref,
                w4_ref, b4_ref,
                w5_ref, b5_ref,
                o_ref):
    # In-kernel cast (VPU op, hidden under the MXU) instead of a wrapper pass.
    h = x_ref[...].astype(jnp.bfloat16)

    # fc1..fc4 on the MXU: bf16 inputs, f32 accumulation; bias/ReLU in f32.
    z = jnp.dot(h, w1_ref[...], preferred_element_type=jnp.float32) + b1_ref[...]
    h = jnp.maximum(z, 0.0).astype(jnp.bfloat16)

    z = jnp.dot(h, w2_ref[...], preferred_element_type=jnp.float32) + b2_ref[...]
    h = jnp.maximum(z, 0.0).astype(jnp.bfloat16)

    z = jnp.dot(h, w3_ref[...], preferred_element_type=jnp.float32) + b3_ref[...]
    h = jnp.maximum(z, 0.0).astype(jnp.bfloat16)

    z = jnp.dot(h, w4_ref[...], preferred_element_type=jnp.float32) + b4_ref[...]
    h4 = jnp.maximum(z, 0.0)                                    # (tb, 10) f32

    # fc5 (10 -> 1) as w5 (1,10) contracted against h4 (tb,10) on their last
    # dims (A @ B.T): output is (1, tb) — lane-dense by construction, so the
    # sigmoid + store epilogue works on full vregs and a contiguous writeback.
    z5 = lax.dot_general(
        w5_ref[...], h4,
        dimension_numbers=(((1,), (1,)), ((), ())),
        preferred_element_type=jnp.float32) + b5_ref[...]       # (1, tb)

    # Exact sigmoid (exact reciprocal keeps the result strictly in [0, 1]).
    sig = 1.0 / (1.0 + jnp.exp(-z5))
    o_ref[...] = sig.reshape(o_ref.shape).astype(o_ref.dtype)   # (1, 1, tb)


def prepare_params(params):
    """One-time prep (hoisted out of the per-call path):
    transpose nn.Linear weights (out,in)->(in,out), cast MXU-fed weights to
    bf16, reshape biases to (1, out). fc5 params stay f32 (exact final layer)."""
    flat = []
    for name in ("fc1", "fc2", "fc3", "fc4"):
        W, b = params[name]
        flat.append(W.T.astype(jnp.bfloat16))              # (in, out) bf16
        flat.append(b.reshape(1, -1).astype(jnp.float32))  # (1, out)  f32
    W5, b5 = params["fc5"]
    flat.append(W5.reshape(1, -1).astype(jnp.float32))     # (1, 10)   f32
    flat.append(b5.reshape(1, -1).astype(jnp.float32))     # (1, 1)    f32
    return tuple(flat)


def binary_classification4(x, prepared, *, tile_b=1024):
    """x: [B, num_features] float32; prepared: output of prepare_params()."""
    B, F = x.shape

    # Batch tile: multiple of 8 sublanes, clamped to (rounded-up) batch size.
    tb = min(tile_b, _round_up(B, 8))
    num_tiles = pl.cdiv(B, tb)          # ragged last block handled by Pallas

    x_spec = pl.BlockSpec((tb, F), lambda i: (i, 0))
    # Full-shape blocks with constant index_maps: no re-DMA across grid steps,
    # so the ~170 KB of parameters stays resident in VMEM.
    param_specs = [pl.BlockSpec(p.shape, lambda i: (0, 0)) for p in prepared]
    # Lane-dense output slab: one (1, 1, tb) row per batch tile.
    out_spec = pl.BlockSpec((1, 1, tb), lambda i: (i, 0, 0))

    out = pl.pallas_call(
        _mlp_kernel,
        out_shape=jax.ShapeDtypeStruct((num_tiles, 1, tb), jnp.float32),
        grid=(num_tiles,),
        in_specs=[x_spec] + param_specs,
        out_specs=out_spec,
        compiler_params=pltpu.CompilerParams(
            dimension_semantics=("parallel",)),
    )(x, *prepared)

    # Reshape the slab back to (B, 1); overhang rows (if any) are dropped.
    return out.reshape(num_tiles * tb)[:B].reshape(B, 1)


def init_params(key, num_features):
    """Deterministic init mimicking nn.Linear shapes: W (out, in), b (out,)."""
    sizes = [(300, num_features), (100, 300), (30, 100), (10, 30), (1, 10)]
    names = ("fc1", "fc2", "fc3", "fc4", "fc5")
    params = {}
    for name, (out_f, in_f) in zip(names, sizes):
        key, kw, kb = jax.random.split(key, 3)
        bound = 1.0 / jnp.sqrt(jnp.float32(in_f))
        W = jax.random.uniform(kw, (out_f, in_f), jnp.float32, -bound, bound)
        b = jax.random.uniform(kb, (out_f,), jnp.float32, -bound, bound)
        params[name] = (W, b)
    return params


def reference_forward(x, params):
    h = x
    for name in ("fc1", "fc2", "fc3", "fc4"):
        W, b = params[name]
        h = jnp.maximum(h @ W.T + b, 0.0)
    W, b = params["fc5"]
    return jax.nn.sigmoid(h @ W.T + b)


if __name__ == "__main__":
    key = jax.random.PRNGKey(0)
    key, kx, kx2 = jax.random.split(key, 3)

    batch, num_features = 8, 32
    x = jax.random.normal(kx, (batch, num_features), jnp.float32)
    params = init_params(key, num_features)
    prepared = prepare_params(params)

    # Small-batch run (single grid step, tile shrinks to the rounded batch).
    out = jax.block_until_ready(binary_classification4(x, prepared))
    ref = reference_forward(x, params)
    assert out.shape == (batch, 1)
    # bf16 MXU inputs -> relaxed tolerance vs the pure-f32 reference.
    assert jnp.allclose(out, ref, atol=2e-2, rtol=2e-2), (out, ref)

    # Larger, non-tile-aligned batch with a small tile to exercise the
    # multi-tile grid and the ragged (un-padded) last block.
    batch2 = 1000
    x2 = jax.random.normal(kx2, (batch2, num_features), jnp.float32)
    out2 = jax.block_until_ready(
        binary_classification4(x2, prepared, tile_b=256))
    ref2 = reference_forward(x2, params)
    assert out2.shape == (batch2, 1)
    assert jnp.allclose(out2, ref2, atol=2e-2, rtol=2e-2)

    print("KERNEL_OK")
</pallas_src>

<mosaic_0001>
module attributes {stable_mosaic.version = 11 : i64} {
  func.func @_mlp_kernel(%arg0: i32, %arg1: memref<8x32xf32, #tpu.memory_space<vmem>>, %arg2: memref<32x300xbf16, #tpu.memory_space<vmem>>, %arg3: memref<1x300xf32, #tpu.memory_space<vmem>>, %arg4: memref<300x100xbf16, #tpu.memory_space<vmem>>, %arg5: memref<1x100xf32, #tpu.memory_space<vmem>>, %arg6: memref<100x30xbf16, #tpu.memory_space<vmem>>, %arg7: memref<1x30xf32, #tpu.memory_space<vmem>>, %arg8: memref<30x10xbf16, #tpu.memory_space<vmem>>, %arg9: memref<1x10xf32, #tpu.memory_space<vmem>>, %arg10: memref<1x10xf32, #tpu.memory_space<vmem>>, %arg11: memref<1x1xf32, #tpu.memory_space<vmem>>, %arg12: memref<1x1x8xf32, #tpu.memory_space<vmem>>) attributes {dimension_semantics = [#tpu.dimension_semantics<parallel>], iteration_bounds = array<i64: 1>, scalar_prefetch = 0 : i64, scratch_operands = 0 : i64, tpu.core_type = #tpu.core_type<tc>, window_params = [{transform_indices = @transform_0, window_bounds = array<i64: 8, 32>}, {pipeline_mode = #tpu.pipeline_mode<synchronous>, transform_indices = @transform_1, window_bounds = array<i64: 32, 300>}, {pipeline_mode = #tpu.pipeline_mode<synchronous>, transform_indices = @transform_2, window_bounds = array<i64: 1, 300>}, {pipeline_mode = #tpu.pipeline_mode<synchronous>, transform_indices = @transform_3, window_bounds = array<i64: 300, 100>}, {pipeline_mode = #tpu.pipeline_mode<synchronous>, transform_indices = @transform_4, window_bounds = array<i64: 1, 100>}, {pipeline_mode = #tpu.pipeline_mode<synchronous>, transform_indices = @transform_5, window_bounds = array<i64: 100, 30>}, {pipeline_mode = #tpu.pipeline_mode<synchronous>, transform_indices = @transform_6, window_bounds = array<i64: 1, 30>}, {pipeline_mode = #tpu.pipeline_mode<synchronous>, transform_indices = @transform_7, window_bounds = array<i64: 30, 10>}, {pipeline_mode = #tpu.pipeline_mode<synchronous>, transform_indices = @transform_8, window_bounds = array<i64: 1, 10>}, {pipeline_mode = #tpu.pipeline_mode<synchronous>, transform_indices = @transform_9, window_bounds = array<i64: 1, 10>}, {pipeline_mode = #tpu.pipeline_mode<synchronous>, transform_indices = @transform_10, window_bounds = array<i64: 1, 1>}, {transform_indices = @transform_11, window_bounds = array<i64: 1, 1, 8>}]} {
    %c0 = arith.constant 0 : index
    %c0_0 = arith.constant 0 : index
    %0 = vector.load %arg1[%c0, %c0_0] : memref<8x32xf32, #tpu.memory_space<vmem>>, vector<8x32xf32>
    %1 = arith.truncf %0 : vector<8x32xf32> to vector<8x32xbf16>
    %c0_1 = arith.constant 0 : index
    %c0_2 = arith.constant 0 : index
    %2 = vector.load %arg2[%c0_1, %c0_2] : memref<32x300xbf16, #tpu.memory_space<vmem>>, vector<32x300xbf16>
    %cst = arith.constant dense<0.000000e+00> : vector<8x300xf32>
    %3 = tpu.matmul %1, %2, %cst {dimension_numbers = #tpu.dot_dimension_numbers<[1], [0], [0], [1], [0, 0, 1, 1], [], []>} : vector<8x32xbf16>, vector<32x300xbf16>, vector<8x300xf32> -> vector<8x300xf32>
    %c0_3 = arith.constant 0 : index
    %c0_4 = arith.constant 0 : index
    %4 = vector.load %arg3[%c0_3, %c0_4] : memref<1x300xf32, #tpu.memory_space<vmem>>, vector<1x300xf32>
    %5 = vector.broadcast %4 : vector<1x300xf32> to vector<8x300xf32>
    %6 = arith.addf %3, %5 : vector<8x300xf32>
    %cst_5 = arith.constant 0.000000e+00 : f32
    %7 = vector.broadcast %cst_5 : f32 to vector<8x300xf32>
    %8 = arith.maximumf %6, %7 : vector<8x300xf32>
    %9 = arith.truncf %8 : vector<8x300xf32> to vector<8x300xbf16>
    %c0_6 = arith.constant 0 : index
    %c0_7 = arith.constant 0 : index
    %10 = vector.load %arg4[%c0_6, %c0_7] : memref<300x100xbf16, #tpu.memory_space<vmem>>, vector<300x100xbf16>
    %cst_8 = arith.constant dense<0.000000e+00> : vector<8x100xf32>
    %11 = tpu.matmul %9, %10, %cst_8 {dimension_numbers = #tpu.dot_dimension_numbers<[1], [0], [0], [1], [0, 0, 1, 1], [], []>} : vector<8x300xbf16>, vector<300x100xbf16>, vector<8x100xf32> -> vector<8x100xf32>
    %c0_9 = arith.constant 0 : index
    %c0_10 = arith.constant 0 : index
    %12 = vector.load %arg5[%c0_9, %c0_10] : memref<1x100xf32, #tpu.memory_space<vmem>>, vector<1x100xf32>
    %13 = vector.broadcast %12 : vector<1x100xf32> to vector<8x100xf32>
    %14 = arith.addf %11, %13 : vector<8x100xf32>
    %cst_11 = arith.constant 0.000000e+00 : f32
    %15 = vector.broadcast %cst_11 : f32 to vector<8x100xf32>
    %16 = arith.maximumf %14, %15 : vector<8x100xf32>
    %17 = arith.truncf %16 : vector<8x100xf32> to vector<8x100xbf16>
    %c0_12 = arith.constant 0 : index
    %c0_13 = arith.constant 0 : index
    %18 = vector.load %arg6[%c0_12, %c0_13] : memref<100x30xbf16, #tpu.memory_space<vmem>>, vector<100x30xbf16>
    %cst_14 = arith.constant dense<0.000000e+00> : vector<8x30xf32>
    %19 = tpu.matmul %17, %18, %cst_14 {dimension_numbers = #tpu.dot_dimension_numbers<[1], [0], [0], [1], [0, 0, 1, 1], [], []>} : vector<8x100xbf16>, vector<100x30xbf16>, vector<8x30xf32> -> vector<8x30xf32>
    %c0_15 = arith.constant 0 : index
    %c0_16 = arith.constant 0 : index
    %20 = vector.load %arg7[%c0_15, %c0_16] : memref<1x30xf32, #tpu.memory_space<vmem>>, vector<1x30xf32>
    %21 = vector.broadcast %20 : vector<1x30xf32> to vector<8x30xf32>
    %22 = arith.addf %19, %21 : vector<8x30xf32>
    %cst_17 = arith.constant 0.000000e+00 : f32
    %23 = vector.broadcast %cst_17 : f32 to vector<8x30xf32>
    %24 = arith.maximumf %22, %23 : vector<8x30xf32>
    %25 = arith.truncf %24 : vector<8x30xf32> to vector<8x30xbf16>
    %c0_18 = arith.constant 0 : index
    %c0_19 = arith.constant 0 : index
    %26 = vector.load %arg8[%c0_18, %c0_19] : memref<30x10xbf16, #tpu.memory_space<vmem>>, vector<30x10xbf16>
    %cst_20 = arith.constant dense<0.000000e+00> : vector<8x10xf32>
    %27 = tpu.matmul %25, %26, %cst_20 {dimension_numbers = #tpu.dot_dimension_numbers<[1], [0], [0], [1], [0, 0, 1, 1], [], []>} : vector<8x30xbf16>, vector<30x10xbf16>, vector<8x10xf32> -> vector<8x10xf32>
    %c0_21 = arith.constant 0 : index
    %c0_22 = arith.constant 0 : index
    %28 = vector.load %arg9[%c0_21, %c0_22] : memref<1x10xf32, #tpu.memory_space<vmem>>, vector<1x10xf32>
    %29 = vector.broadcast %28 : vector<1x10xf32> to vector<8x10xf32>
    %30 = arith.addf %27, %29 : vector<8x10xf32>
    %cst_23 = arith.constant 0.000000e+00 : f32
    %31 = vector.broadcast %cst_23 : f32 to vector<8x10xf32>
    %32 = arith.maximumf %30, %31 : vector<8x10xf32>
    %c0_24 = arith.constant 0 : index
    %c0_25 = arith.constant 0 : index
    %33 = vector.load %arg10[%c0_24, %c0_25] : memref<1x10xf32, #tpu.memory_space<vmem>>, vector<1x10xf32>
    %cst_26 = arith.constant dense<0.000000e+00> : vector<1x8xf32>
    %34 = tpu.matmul %33, %32, %cst_26 {dimension_numbers = #tpu.dot_dimension_numbers<[1], [1], [0], [0], [0, 0, 1, 0], [], []>} : vector<1x10xf32>, vector<8x10xf32>, vector<1x8xf32> -> vector<1x8xf32>
    %c0_27 = arith.constant 0 : index
    %c0_28 = arith.constant 0 : index
    %35 = vector.load %arg11[%c0_27, %c0_28] : memref<1x1xf32, #tpu.memory_space<vmem>>, vector<1x1xf32>
    %36 = vector.broadcast %35 : vector<1x1xf32> to vector<1x8xf32>
    %37 = arith.addf %34, %36 : vector<1x8xf32>
    %cst_29 = arith.constant 0.000000e+00 : f32
    %38 = vector.broadcast %cst_29 : f32 to vector<1x8xf32>
    %39 = arith.subf %38, %37 : vector<1x8xf32>
    %40 = math.exp %39 : vector<1x8xf32>
    %cst_30 = arith.constant 1.000000e+00 : f32
    %41 = vector.broadcast %cst_30 : f32 to vector<1x8xf32>
    %42 = arith.addf %41, %40 : vector<1x8xf32>
    %cst_31 = arith.constant 1.000000e+00 : f32
    %43 = vector.broadcast %cst_31 : f32 to vector<1x8xf32>
    %44 = arith.divf %43, %42 : vector<1x8xf32>
    %45 = vector.shape_cast %44 : vector<1x8xf32> to vector<1x1x8xf32>
    %c0_32 = arith.constant 0 : index
    %c0_33 = arith.constant 0 : index
    %c0_34 = arith.constant 0 : index
    %46 = vector.load %arg12[%c0_32, %c0_33, %c0_34] : memref<1x1x8xf32, #tpu.memory_space<vmem>>, vector<1x1x8xf32>
    tpu.vector_store %arg12[%c0_32, %c0_33, %c0_34], %45 {strides = array<i32>} : memref<1x1x8xf32, #tpu.memory_space<vmem>>, vector<1x1x8xf32>,
    return
  }
  func.func @transform_0(%arg0: i32) -> (i32, i32) {
    %c0_i32 = arith.constant 0 : i32
    %c0_i32_0 = arith.constant 0 : i32
    return %arg0, %c0_i32 : i32, i32
  }
  func.func @transform_1(%arg0: i32) -> (i32, i32) {
    %c0_i32 = arith.constant 0 : i32
    %c0_i32_0 = arith.constant 0 : i32
    %c0_i32_1 = arith.constant 0 : i32
    return %c0_i32, %c0_i32_0 : i32, i32
  }
  func.func @transform_2(%arg0: i32) -> (i32, i32) {
    %c0_i32 = arith.constant 0 : i32
    %c0_i32_0 = arith.constant 0 : i32
    %c0_i32_1 = arith.constant 0 : i32
    return %c0_i32, %c0_i32_0 : i32, i32
  }
  func.func @transform_3(%arg0: i32) -> (i32, i32) {
    %c0_i32 = arith.constant 0 : i32
    %c0_i32_0 = arith.constant 0 : i32
    %c0_i32_1 = arith.constant 0 : i32
    return %c0_i32, %c0_i32_0 : i32, i32
  }
  func.func @transform_4(%arg0: i32) -> (i32, i32) {
    %c0_i32 = arith.constant 0 : i32
    %c0_i32_0 = arith.constant 0 : i32
    %c0_i32_1 = arith.constant 0 : i32
    return %c0_i32, %c0_i32_0 : i32, i32
  }
  func.func @transform_5(%arg0: i32) -> (i32, i32) {
    %c0_i32 = arith.constant 0 : i32
    %c0_i32_0 = arith.constant 0 : i32
    %c0_i32_1 = arith.constant 0 : i32
    return %c0_i32, %c0_i32_0 : i32, i32
  }
  func.func @transform_6(%arg0: i32) -> (i32, i32) {
    %c0_i32 = arith.constant 0 : i32
    %c0_i32_0 = arith.constant 0 : i32
    %c0_i32_1 = arith.constant 0 : i32
    return %c0_i32, %c0_i32_0 : i32, i32
  }
  func.func @transform_7(%arg0: i32) -> (i32, i32) {
    %c0_i32 = arith.constant 0 : i32
    %c0_i32_0 = arith.constant 0 : i32
    %c0_i32_1 = arith.constant 0 : i32
    return %c0_i32, %c0_i32_0 : i32, i32
  }
  func.func @transform_8(%arg0: i32) -> (i32, i32) {
    %c0_i32 = arith.constant 0 : i32
    %c0_i32_0 = arith.constant 0 : i32
    %c0_i32_1 = arith.constant 0 : i32
    return %c0_i32, %c0_i32_0 : i32, i32
  }
  func.func @transform_9(%arg0: i32) -> (i32, i32) {
    %c0_i32 = arith.constant 0 : i32
    %c0_i32_0 = arith.constant 0 : i32
    %c0_i32_1 = arith.constant 0 : i32
    return %c0_i32, %c0_i32_0 : i32, i32
  }
  func.func @transform_10(%arg0: i32) -> (i32, i32) {
    %c0_i32 = arith.constant 0 : i32
    %c0_i32_0 = arith.constant 0 : i32
    %c0_i32_1 = arith.constant 0 : i32
    return %c0_i32, %c0_i32_0 : i32, i32
  }
  func.func @transform_11(%arg0: i32) -> (i32, i32, i32) {
    %c0_i32 = arith.constant 0 : i32
    %c0_i32_0 = arith.constant 0 : i32
    %c0_i32_1 = arith.constant 0 : i32
    return %arg0, %c0_i32, %c0_i32_0 : i32, i32, i32
  }
}

</mosaic_0001>

<bundles_post_ra>
// kernel: tpu_custom_call.1
= control target key start
LH: loop header
LB: loop body
LE: loop exit
PB: predicated region body
PF: predicated region fallthrough
CT: control target
= control target key end

     0   :  { %s1167_s0 = inlined_call_operand.vmem [shape: f32[8,32], index: 0, kind: input, shape index: {}]   ;;  %s1168_s1 = inlined_call_operand.vmem [shape: bf16[32,300], index: 1, kind: input, shape index: {}]   ;;  %s1169_s2 = inlined_call_operand.vmem [shape: f32[1,300], index: 2, kind: input, shape index: {}]   ;;  %s1170_s3 = inlined_call_operand.hbm [shape: bf16[300,100], index: 3, kind: input, shape index: {}]   ;;  %s1171_s4 = inlined_call_operand.vmem [shape: f32[1,100], index: 4, kind: input, shape index: {}]   ;;  %s1172_s5 = inlined_call_operand.vmem [shape: bf16[100,30], index: 5, kind: input, shape index: {}]   ;;  %s1173_s6 = inlined_call_operand.vmem [shape: f32[1,30], index: 6, kind: input, shape index: {}]   ;;  %s1174_s7 = inlined_call_operand.vmem [shape: bf16[30,10], index: 7, kind: input, shape index: {}]   ;;  %s1175_s8 = inlined_call_operand.vmem [shape: f32[1,10], index: 8, kind: input, shape index: {}]   ;;  %s1176_s9 = inlined_call_operand.vmem [shape: f32[1,10], index: 9, kind: input, shape index: {}]   ;;  %s1177_s10 = inlined_call_operand.<no memory space> [shape: f32[1,1], index: 10, kind: input, shape index: {}]   ;;  %s1178_s11 = inlined_call_operand.hbm [shape: f32[1,1,8], index: 11, kind: output, shape index: {}]  }
   0x1   :  { %v16_v0 = vstv %s1177_s10 }
   0x2   :  { %17 = vst [vmem:[#allocation2] sm:$0x1] %v16_v0 }
   0x3   :  { %18 = vsyncpa [#allocation4], 0 }
   0x4   :  { %19 = vsyncpa [#allocation5], 0  ;;  %s976_s19 = smov [#allocation3]   ;;  %s928_s23 = scalar_lea.hbm %s1170_s3, 2432 }
   0x5   :  { %s31_s20 = sshll.u32 %s976_s19, 4  ;;  %p929_p0 = scmp.ne.s32.totalorder %s1170_s3, %s928_s23  ;;  %s32_s20 = int_to_ptr.vmem [resolvable:$true] %s31_s20 }
   0x6   :  { %p932_p1 = scmp.lt.u32.totalorder %s928_s23, %s1170_s3 }
   0x8   :  { %p934_p2 = pnand %p932_p1, %p929_p0 }
   0xa   :  { %937 = shalt.err (!%p934_p2)
}
   0xb   :  { %s938_s10 = scalar_lea.vmem %s32_s20, 2432  ;;  %p943_p4 = scmp.lt.s32.totalorder %s32_s20, %s32_s20 }
   0xc   :  { %p939_p3 = scmp.ne.s32.totalorder %s32_s20, %s938_s10  ;;  %p944_p5 = scmp.lt.s32.totalorder %s938_s10, %s938_s10 }
   0xe   :  { %p945_p6 = por %p944_p5, %p943_p4 }
  0x10   :  { %p946_p7 = pnand %p945_p6, %p939_p3 }
  0x12   :  { %949 = shalt.err (!%p946_p7)
}
  0x13   :  { %s977_s28 = smov 64   ;;  %s978_s29 = smov 4  }
  0x14   :  { %37 = dma.hbm_to_vmem [thread:$0]  %s1170_s3, 2432, %s32_s20, [#allocation4], %s977_s28, %s977_s28, %s978_s29  }
  0x15   :  { %972 = dma.done.wait [#allocation4], 2432  }
  0x16   :  { %973 = vsyncadd [#allocation4], 4294964864  ;;  %v979_v1 = vmov 0.0   ;;  %v980_v2 = vmov 0   ;;  %vm981_vm0 = vmmov 0   ;;  %v56_v8 = vld [vmem:[%s1167_s0] sm:$0xff]  ;;  %v68_v31 = vlaneseq }
  0x17   :  { %831 = vmatprep.subr.bf16.mxu1 %v979_v1  ;;  %151 = vmatprep.mubr.bf16.mxu0 %v980_v2  ;;  %v888_v3 = vld [vmem:[%s1168_s1 + $0x4] ss:$12 sps:$4 sm:$0xff]   ;;  %v890_v4 = vld [vmem:[%s1168_s1] ss:$12 sps:$4 sm:$0xff]   ;;  %v891_v5 = vld [vmem:[%s1168_s1 + $0x1c] ss:$12 sps:$4 sm:$0xff]   ;;  %v57_v11 = vpack.c.bf16 %v56_v8, %v56_v8 }
  0x18   :  { %835 = vmatprep.mubr.msk.bf16.mxu1 %vm981_vm0, %v979_v1  ;;  %887 = vset.pattern.permute.xlu0 %v980_v2  ;;  %v893_v6 = vld [vmem:[%s1168_s1 + $0x18] ss:$12 sps:$4 sm:$0xff]   ;;  %v894_v7 = vld [vmem:[%s1168_s1 + $0x8] ss:$12 sps:$4 sm:$0xff]   ;;  %v895_v9 = vld [vmem:[%s1168_s1 + $0x20] ss:$12 sps:$4 sm:$0xff]  }
  0x19   :  { %119 = vmatprep.subr.bf16.mxu0 %v888_v3  ;;  %832 = vmatpush3.bf16.msra.mxu1 %v894_v7  ;;  %v896_v10 = vld [vmem:[#allocation3 + $0x40] sm:$0xff]   ;;  %vm115_vm1 = vcmask 261120   ;;  %v898_v13 = vld [vmem:[#allocation3 + $0x48] sm:$0xff]   ;;  %v900_v15 = vld [vmem:[#allocation3 + $0x50] sm:$0xff]   ;;  %vm368_vm2 = vcmask 1045504   ;;  %v1090_v32 = vshrl.u32 %v68_v31, 7 }
  0x1a   :  { %120 = vmatpush1.bf16.msra.mxu0 %v890_v4  ;;  %833 = vmatprep.subr.bf16.mxu1 %v979_v1  ;;  %v897_v12 = vld [vmem:[#allocation3] sm:$0xff]   ;;  %v899_v14 = vld [vmem:[#allocation3 + $0x8] sm:$0xff]   ;;  %v901_v16 = vld [vmem:[#allocation3 + $0x10] sm:$0xff]   ;;  %vm364_vm3 = vcmask 359424   ;;  %vm517_vm4 = vcmask 1041408   ;;  %vm513_vm5 = vcmask 818176  }
  0x1b   :  { %121 = vmatprep.subr.bf16.mxu0 %v891_v5  ;;  %v902_v17 = vld [vmem:[#allocation3 + $0x58] sm:$0xff]   ;;  %v904_v19 = vld [vmem:[#allocation3 + $0x60] sm:$0xff]   ;;  %v906_v21 = vld [vmem:[#allocation3 + $0x68] sm:$0xff]   ;;  %v70_v33 = vsub.s32 0, %v1090_v32  ;;  %v74_v35 = vsub.s32 1, %v1090_v32  ;;  %v78_v36 = vsub.s32 2, %v1090_v32 }
  0x1c   :  { %v903_v18 = vld [vmem:[#allocation3 + $0x18] sm:$0xff]   ;;  %v905_v20 = vld [vmem:[#allocation3 + $0x20] sm:$0xff]   ;;  %v907_v22 = vld [vmem:[#allocation3 + $0x28] sm:$0xff]   ;;  %vm589_vm6 = vcmask 1046528   ;;  %vm585_vm7 = vcmask 244736   ;;  %vm645_vm8 = vcmask 80896  }
  0x1d   :  { %834 = vmatpush3.bf16.msra.mxu1 %v895_v9  ;;  %v908_v23 = vld [vmem:[#allocation3 + $0x80] sm:$0xff]   ;;  %v909_v24 = vld [vmem:[#allocation3 + $0x70] sm:$0xff]   ;;  %v911_v26 = vld [vmem:[#allocation3 + $0x88] sm:$0xff]   ;;  %vm728_vm9 = vcmask 57344  }
  0x1e   :  { %122 = vmatpush1.bf16.msra.mxu0 %v893_v6  ;;  %839 = vmatprep.subr.bf16.mxu1 %v979_v1  ;;  %v910_v25 = vld [vmem:[#allocation3 + $0x30] sm:$0xff]   ;;  %v912_v27 = vld [vmem:[#allocation3 + $0x78] sm:$0xff]   ;;  %v916_v58 = vld [vmem:[%s1172_s5 + $0x8] sm:$0xff]  }
  0x1f   :  { %792 = vmatprep.subr.bf16.mxu0 %v896_v10  ;;  %v913_v28 = vld [vmem:[#allocation3 + $0x38] sm:$0xff]   ;;  %v914_v29 = vld [vmem:[#allocation3 + $0x90] sm:$0x3f]   ;;  %v920_v62 = vld [vmem:[%s1172_s5 + $0x28] sm:$0xff]  }
  0x20   :  { %836 = vmatmul.mubr.msk.bf16.vlgmr.msra.gmra.mrb[0].mxu1 %vm115_vm1, %v57_v11  ;;  %v370_v30 = vsel %vm368_vm2, %v914_v29, 0  ;;  %v66_v34 = vld [vmem:[%s1169_s2] sm:$0x7]  ;;  %v917_v59 = vld [vmem:[%s1172_s5 + $0x10] sm:$0xff]   ;;  %v918_v60 = vld [vmem:[%s1172_s5 + $0x18] sm:$0xff]  }
  0x21   :  { %751 = vmatmul.mubr.msk.bf16.vlgmr.msra.gmra.mrb[0].mxu0 %vm115_vm1, %v57_v11  ;;  %845 = vmatprep.mubr.msk.bf16.mxu1 %vm981_vm0, %v979_v1  ;;  %v71_v37 = vrot.slane %v66_v34, %v70_v33  ;;  %v75_v38 = vrot.slane %v66_v34, %v74_v35  ;;  %v79_v39 = vrot.slane %v66_v34, %v78_v36  ;;  %v915_v55 = vld [vmem:[%s1172_s5] sm:$0xff]   ;;  %v921_v63 = vld [vmem:[%s1172_s5 + $0x30] ss:$0 sps:$4 sm:$0x33]  }
  0x22   :  { %793 = vmatpush3.bf16.msra.mxu0 %v897_v12  ;;  %840 = vmatpush3.bf16.msra.mxu1 %v908_v23  ;;  %v919_v61 = vld [vmem:[%s1172_s5 + $0x20] sm:$0xff]   ;;  %v519_v0 = vsel %vm517_vm4, %v921_v63, 0 }
  0x23   :  { %794 = vmatprep.subr.bf16.mxu0 %v898_v13  ;;  %841 = vmatprep.subr.bf16.mxu1 %v979_v1  ;;  %v753_v5 = vld [vmem:[%s1171_s4] ss:$0 sm:$0xff] }
  0x26   :  { %795 = vmatpush3.bf16.msra.mxu0 %v899_v14  ;;  %842 = vmatpush3.bf16.msra.mxu1 %v911_v26 }
  0x27   :  { %796 = vmatprep.subr.bf16.mxu0 %v900_v15  ;;  %843 = vmatprep.subr.bf16.mxu1 %v979_v1 }
  0x2a   :  { %797 = vmatpush3.bf16.msra.mxu0 %v901_v16  ;;  %844 = vmatpush3.bf16.msra.mxu1 %v370_v30  ;;  %v922_v16 = vld [vmem:[%s1174_s7] sm:$0xff]  }
  0x2b   :  { %798 = vmatprep.subr.bf16.mxu0 %v902_v17  ;;  %849 = vmatprep.subr.bf16.mxu1 %v979_v1  ;;  %v923_v17 = vld [vmem:[%s1174_s7 + $0x8] sm:$0x7f]  }
  0x2e   :  { %799 = vmatpush3.bf16.msra.mxu0 %v903_v18  ;;  %v591_v18 = vsel %vm589_vm6, %v923_v17, 0 }
  0x2f   :  { %800 = vmatprep.subr.bf16.mxu0 %v904_v19  ;;  %v774_v19 = vld [vmem:[%s1173_s6] ss:$0 sm:$0xff] }
  0x32   :  { %801 = vmatpush3.bf16.msra.mxu0 %v905_v20 }
  0x33   :  { %802 = vmatprep.subr.bf16.mxu0 %v906_v21 }
  0x36   :  { %803 = vmatpush3.bf16.msra.mxu0 %v907_v22 }
  0x37   :  { %804 = vmatprep.subr.bf16.mxu0 %v909_v24 }
  0x3a   :  { %805 = vmatpush3.bf16.msra.mxu0 %v910_v25 }
  0x3b   :  { %806 = vmatprep.subr.bf16.mxu0 %v912_v27  ;;  %v635_v27 = vld [vmem:[#allocation2] sm:$0x1] }
  0x3c   :  { %638 = vperm.xlu0 %887, %v635_v27  }
  0x3e   :  { %807 = vmatpush3.bf16.msra.mxu0 %v913_v28  ;;  %v783_v28 = vld [vmem:[%s1175_s8] ss:$0 sm:$0xff]  ;;  %s982_s8 = smov [#allocation6]  }
  0x3f   :  { %867 = vmatprep.subr.bf16.mxu0 %v979_v1  ;;  %s736_s0 = sshll.u32 %s982_s8, 4  ;;  %s737_s0 = int_to_ptr.vmem [resolvable:$true] %s736_s0 }
  0x40   :  { %s954_s1 = scalar_lea.vmem %s737_s0, 32  ;;  %p955_p9 = scmp.lt.s32.totalorder %s737_s0, %s737_s0 }
  0xf3   :  { %v194_v45 = vpop.f32.mrb[0].mxu1 }
  0xf4   :  { %v153_v40 = vpop.f32.mrb[0].mxu0  ;;  %v195_v48 = vadd.f32 %v194_v45, %v79_v39  ;;  %v837_v49 = vpop.f32.mrb[1].mxu1 }
  0xf5   :  { %v154_v41 = vadd.f32 %v153_v40, %v71_v37  ;;  %v155_v42 = vpop.f32.mrb[1].mxu0  ;;  %v197_v51 = vpop.f32.mrb[2].mxu1  ;;  %v634_v37 = vld [vmem:[%s1176_s9] sm:$0x1]  ;;  %s950_s9 = scalar_lea.vmem %s737_s0, 16 }
  0xf6   :  { %v156_v43 = vadd.f32 %v155_v42, %v75_v38  ;;  %v157_v44 = vpop.f32.mrb[2].mxu0  ;;  %v202_v52 = vmax.f32 %v195_v48, 0.0  ;;  %v838_v53 = vpop.f32.mrb[3].mxu1  ;;  %p951_p8 = scmp.ne.s32.totalorder %s737_s0, %s950_s9  ;;  %p956_p10 = scmp.lt.s32.totalorder %s954_s1, %s950_s9 }
  0xf7   :  { %v200_v46 = vmax.f32 %v154_v41, 0.0  ;;  %v158_v47 = vpop.f32.mrb[3].mxu0 }
  0xf8   :  { %v201_v50 = vmax.f32 %v156_v43, 0.0  ;;  %v205_v57 = vpack.c.bf16 %v202_v52, %v202_v52  ;;  %p957_p11 = por %p956_p10, %p955_p9 }
  0xf9   :  { %v203_v56 = vpack.c.bf16 %v200_v46, %v200_v46 }
  0xfa   :  { %v204_v54 = vpack.c.bf16 %v201_v50, %v201_v50  ;;  %846 = vmatmul.mubr.msk.bf16.vlgmr.msra.gmra.mrb[4].mxu1 %vm364_vm3, %v205_v57  ;;  %p958_p12 = pnand %p957_p11, %p951_p8 }
  0xfb   :  { %850 = vmatpush3.bf16.msra.mxu1 %v915_v55  ;;  %863 = vmatprep.mubr.msk.bf16.mxu1 %vm981_vm0, %v979_v1 }
  0xfc   :  { %404 = vmatprep.mubr.bf16.mxu0 %v204_v54  ;;  %851 = vmatprep.subr.bf16.mxu1 %v979_v1 }
  0xfd   :  { %405 = vmatmul.mubr.bf16.vlgmr.msra.gmra.mrb[4].mxu0 %v203_v56 }
  0xfe   :  { %871 = vmatprep.mubr.msk.bf16.mxu0 %vm981_vm0, %v979_v1  ;;  %868 = vmatpush3.bf16.msra.mxu0 %v922_v16 }
  0xff   :  { %852 = vmatpush3.bf16.msra.mxu1 %v916_v58  ;;  %869 = vmatprep.subr.bf16.mxu0 %v979_v1 }
 0x100   :  { %853 = vmatprep.subr.bf16.mxu1 %v979_v1 }
 0x102   :  { %870 = vmatpush3.bf16.msra.mxu0 %v591_v18 }
 0x103   :  { %854 = vmatpush3.bf16.msra.mxu1 %v917_v59  ;;  %875 = vmatprep.subr.mxu0 %v979_v1 }
 0x104   :  { %855 = vmatprep.subr.bf16.mxu1 %v979_v1 }
 0x107   :  { %856 = vmatpush3.bf16.msra.mxu1 %v918_v60 }
 0x108   :  { %857 = vmatprep.subr.bf16.mxu1 %v979_v1 }
 0x10b   :  { %858 = vmatpush3.bf16.msra.mxu1 %v919_v61 }
 0x10c   :  { %859 = vmatprep.subr.bf16.mxu1 %v979_v1 }
 0x10f   :  { %860 = vmatpush3.bf16.msra.mxu1 %v920_v62 }
 0x110   :  { %861 = vmatprep.subr.bf16.mxu1 %v979_v1 }
 0x113   :  { %862 = vmatpush3.bf16.msra.mxu1 %v519_v0 }
 0x1cd   :  { %v446_v3 = vpop.f32.mrb[4].mxu1 }
 0x1ce   :  { %v847_v6 = vpop.f32.mrb[5].mxu1 }
 0x1cf   :  { %v449_v9 = vpop.f32.mrb[6].mxu1 }
 0x1d0   :  { %v808_v2 = vpop.f32.mrb[4].mxu0  ;;  %v848_v11 = vpop.f32.mrb[7].mxu1 }
 0x1d1   :  { %v809_v4 = vpop.f32.mrb[5].mxu0 }
 0x1d2   :  { %v810_v7 = vadd.f32 %v809_v4, %v808_v2  ;;  %v811_v8 = vpop.f32.mrb[6].mxu0 }
 0x1d3   :  { %v812_v10 = vpop.f32.mrb[7].mxu0 }
 0x1d4   :  { %v407_v12 = vadd.f32 %v810_v7, %v753_v5 }
 0x1d6   :  { %v447_v13 = vadd.f32 %v446_v3, %v407_v12 }
 0x1d8   :  { %v452_v14 = vmax.f32 %v447_v13, 0.0 }
 0x1da   :  { %v453_v15 = vpack.c.bf16 %v452_v14, %v452_v14 }
 0x1dc   :  { %864 = vmatmul.mubr.msk.bf16.vlgmr.msra.gmra.mrb[8].mxu1 %vm513_vm5, %v453_v15 }
 0x2af   :  { %v555_v20 = vpop.f32.mrb[8].mxu1 }
 0x2b0   :  { %v556_v21 = vadd.f32 %v774_v19, %v555_v20  ;;  %v865_v22 = vpop.f32.mrb[9].mxu1 }
 0x2b1   :  { %v558_v23 = vpop.f32.mrb[10].mxu1 }
 0x2b2   :  { %v561_v24 = vmax.f32 %v556_v21, 0.0  ;;  %v866_v25 = vpop.f32.mrb[11].mxu1 }
 0x2b4   :  { %v562_v26 = vpack.c.bf16 %v561_v24, %v561_v24 }
 0x2b6   :  { %872 = vmatmul.mubr.msk.bf16.vlgmr.msra.gmra.mrb[8].mxu0 %vm585_vm7, %v562_v26 }
 0x2b7   :  { %877 = vmatprep.mubr.msk.f32.mxu0 %vm981_vm0, %v979_v1  ;;  %v639_v1 = vpop.permute.xlu0 %638 }
 0x2b8   :  { %v644_v38 = vrot.slane %v639_v1, %v70_v33 }
 0x389   :  { %v627_v29 = vpop.f32.mrb[8].mxu0 }
 0x38a   :  { %v628_v30 = vadd.f32 %v783_v28, %v627_v29  ;;  %v873_v31 = vpop.f32.mrb[9].mxu0 }
 0x38b   :  { %v630_v34 = vpop.f32.mrb[10].mxu0 }
 0x38c   :  { %v633_v35 = vmax.f32 %v628_v30, 0.0  ;;  %v874_v36 = vpop.f32.mrb[11].mxu0 }
 0x38e   :  { %876 = vmatpush3.xpose.msk.msra.mxu0 %vm645_vm8, %v633_v35 }
 0x391   :  { %878 = vmatmul.mubr.msk.f32.vlgmr.msra.gmra.mrb[12].mxu0 %vm645_vm8, %v634_v37 }
 0x464   :  { %v718_v39 = vpop.f32.mrb[12].mxu0 }
 0x465   :  { %v719_v40 = vadd.f32 %v718_v39, %v644_v38  ;;  %v879_v41 = vpop.f32.mrb[13].mxu0 }
 0x467   :  { %v722_v42 = vsub.f32 0.0, %v719_v40 }
 0x469   :  { %v723_v43 = vmul.f32 1.442695, %v722_v42 }
 0x46b   :  { %924 = vpow2.f32 %v723_v43 }
 0x475   :  { %v925_v44 = vpop.eup %924 }
 0x476   :  { %v725_v45 = vadd.f32 1.0, %v925_v44 }
 0x478   :  { %926 = vrcp.f32 %v725_v45 }
 0x482   :  { %v927_v46 = vpop.eup %926 }
 0x483   :  { %729 = vst.msk [vmem:[#allocation6] sm:$0x1] %vm728_vm9, %v927_v46 }
 0x484   :  { %961 = shalt.err (!%p958_p12)
}
 0x485   :  { %s962_s27 = scalar_lea.hbm %s1178_s11, 16 }
 0x486   :  { %p963_p13 = scmp.ne.s32.totalorder %s1178_s11, %s962_s27  ;;  %p966_p0 = scmp.lt.u32.totalorder %s962_s27, %s1178_s11 }
 0x488   :  { %p968_p1 = pnand %p966_p0, %p963_p13 }
 0x48a   :  { %971 = shalt.err (!%p968_p1)
}
 0x48b   :  { %739 = dma.vmem_to_hbm [thread:$0]  %s737_s0, 16, %s1178_s11, [#allocation5]  }
 0x48c   :  { %974 = dma.done.wait [#allocation5], 16  }
 0x48d   :  { %975 = vsyncadd [#allocation5], 4294967280 }
 0x48e   :  { %743 = vsyncpa [#allocation4], 1 }
 0x48f   :  { %744 = vsyncpa [#allocation5], 1 }

</bundles_post_ra>
